<compile_context>
chip_gen: v6e
topology: v6e:2x2x1
jax: 0.10.0
libtpu: 0.0.40
codegen_flags: <defaults>
</compile_context>

<pallas_src>
import functools

import jax
import jax.numpy as jnp
from jax.experimental import pallas as pl
from jax.experimental.pallas import tpu as pltpu

# ----------------------------- config ---------------------------------------
PATCH = 4
IN_CHANS = 6                      # 3 (img_A) + 3 (img_B)
EMBED_DIM = 32                    # real embed width
HIDDEN_DIM = 64                   # real MLP hidden width
NUM_BLOCKS = 2
NUM_CLASSES = 1
LN_EPS = 1e-5

LANE = 128                        # lane-dense padded feature width
CP_REAL = PATCH * PATCH * IN_CHANS          # 96 real patch features
W_MATS = 1 + 2 * NUM_BLOCKS                  # w_pe, (w1, w2) per block
MAX_TOK_TILE = 1024                          # token rows per kernel step (cap)


def _cdiv(a, b):
    return (a + b - 1) // b


def _round_up(x, m):
    return _cdiv(x, m) * m


V_ROWS = _round_up(3 + 4 * NUM_BLOCKS + 2, 8)    # 13 -> 16 packed bias/LN rows


def _choose_token_tile(tokens_per_batch):
    # Biggest 8-aligned tile up to the cap.  Core parallelism comes from the batch
    # grid axis ("parallel"), so no artificial token split is forced anymore.
    return min(MAX_TOK_TILE, _round_up(max(tokens_per_batch, 8), 8))


# ----------------------------- kernel ---------------------------------------
def _layernorm(z, gamma, beta, lane_mask, d_real):
    # Two-pass LayerNorm over the d_real real lanes only (padded lanes of z are
    # exactly zero on entry; lane_mask zeroes the -mu they pick up after centering
    # so they do not inflate the variance).
    inv_d = 1.0 / float(d_real)
    mu = jnp.sum(z, axis=-1, keepdims=True) * inv_d
    zc = (z - mu) * lane_mask
    var = jnp.sum(zc * zc, axis=-1, keepdims=True) * inv_d
    # gamma/beta are zero in padded lanes -> padded lanes stay exactly zero.
    return zc * jax.lax.rsqrt(var + LN_EPS) * gamma + beta


def disc_kernel(x_ref,       # (1, TILE, 128)  bf16 patch tokens (feature-padded)
                w_ref,       # (W_MATS, 128, 128) bf16: [w_pe, w1_0, w2_0, w1_1, w2_1]
                v_ref,       # (V_ROWS, 128) f32 packed biases / LN gammas / betas
                out_ref,     # (8, 128) f32 per-batch mean-pooled features (accumulator)
                *, tile, l_real, l_pad):
    V = v_ref[...]                                   # (V_ROWS, 128) f32, resident

    def vec(i):                                      # (1, 128) f32 row
        return V[i:i + 1, :]

    lane_mask = (jax.lax.broadcasted_iota(jnp.int32, (1, LANE), 1)
                 < EMBED_DIM).astype(jnp.float32)    # real-feature lanes

    x = x_ref[0]                                     # (TILE, 128) bf16

    # Patch embedding (4x4 stride-4 conv as a matmul on flattened patches).
    # TODO(synk): flattening order (PATCH, PATCH, C) must match the torch conv weight
    # export layout when loading real checkpoints.
    h = jnp.dot(x, w_ref[0], preferred_element_type=jnp.float32) + vec(0)
    h = _layernorm(h, vec(1), vec(2), lane_mask, EMBED_DIM)

    # Residual MLP blocks (stand-in for VSS blocks). bf16 MXU, f32 VPU math.
    for i in range(NUM_BLOCKS):
        base = 3 + 4 * i
        y = _layernorm(h, vec(base), vec(base + 1), lane_mask, EMBED_DIM)
        y = jnp.dot(y.astype(jnp.bfloat16), w_ref[1 + 2 * i],
                    preferred_element_type=jnp.float32) + vec(base + 2)
        y = y * jax.nn.sigmoid(y)                    # SiLU in f32 (EUP + VPU)
        y = jnp.dot(y.astype(jnp.bfloat16), w_ref[2 + 2 * i],
                    preferred_element_type=jnp.float32) + vec(base + 3)
        h = h + y

    # Final LayerNorm.
    h = _layernorm(h, vec(3 + 4 * NUM_BLOCKS), vec(4 + 4 * NUM_BLOCKS),
                   lane_mask, EMBED_DIM)

    # ---- in-kernel per-batch mean pooling (accumulate over the token axis) ----
    t = pl.program_id(1)

    @pl.when(t == 0)
    def _():
        out_ref[...] = jnp.zeros_like(out_ref)

    if l_pad != l_real:
        # Mask padded (all-zero) token rows so their LN artifacts never reach the pool.
        rows = jax.lax.broadcasted_iota(jnp.int32, (tile, 1), 0) + t * tile
        h = h * (rows < l_real).astype(jnp.float32)

    rowsum = jnp.sum(h, axis=0, keepdims=True)       # (1, 128) partial token sum
    out_ref[...] = out_ref[...] + jnp.broadcast_to(rowsum, (8, LANE))

    @pl.when(t == pl.num_programs(1) - 1)
    def _():
        out_ref[...] = out_ref[...] * (1.0 / float(l_real))


# ----------------------------- wrapper ---------------------------------------
@jax.jit
def discriminator_forward(img_A, img_B, params):
    B, _, H, W = img_A.shape
    assert H % PATCH == 0 and W % PATCH == 0

    # Cast to bf16 BEFORE the layout pass, then NCHW -> NHWC, channel-last concat.
    a = jnp.transpose(img_A.astype(jnp.bfloat16), (0, 2, 3, 1))
    b = jnp.transpose(img_B.astype(jnp.bfloat16), (0, 2, 3, 1))
    x = jnp.concatenate([a, b], axis=-1)                     # (B, H, W, 6) bf16

    # 4x4 patchify -> tokens (layout plumbing only, all in bf16).
    hp, wp = H // PATCH, W // PATCH
    x = x.reshape(B, hp, PATCH, wp, PATCH, IN_CHANS)
    x = x.transpose(0, 1, 3, 2, 4, 5).reshape(B, hp * wp, CP_REAL)

    L = hp * wp
    tile = _choose_token_tile(L)
    n_tiles = _cdiv(L, tile)
    l_pad = n_tiles * tile

    tokens = jnp.pad(x, ((0, 0), (0, l_pad - L), (0, LANE - CP_REAL)))  # (B, l_pad, 128)

    kernel = functools.partial(disc_kernel, tile=tile, l_real=L, l_pad=l_pad)

    feats = pl.pallas_call(
        kernel,
        out_shape=jax.ShapeDtypeStruct((B * 8, LANE), jnp.float32),
        grid=(B, n_tiles),
        in_specs=[
            pl.BlockSpec((1, tile, LANE), lambda bb, tt: (bb, tt, 0)),     # token tiles
            pl.BlockSpec((W_MATS, LANE, LANE), lambda bb, tt: (0, 0, 0)),  # resident weights
            pl.BlockSpec((V_ROWS, LANE), lambda bb, tt: (0, 0)),           # resident biases/LN
        ],
        out_specs=pl.BlockSpec((8, LANE), lambda bb, tt: (bb, 0)),         # per-batch pooled
        compiler_params=pltpu.CompilerParams(
            dimension_semantics=("parallel", "arbitrary")),
    )(tokens, params["w_stack"], params["v_stack"])

    # Tiny 32->1 head on the (B, 32) pooled features; stays in XLA.
    pooled = feats.reshape(B, 8, LANE)[:, 0, :EMBED_DIM]                   # (B, D)
    logits = pooled @ params["w_h"] + params["b_h"]                        # (B, 1)
    if NUM_CLASSES == 3:                      # num_classes == 1 -> raw logits
        logits = jax.nn.sigmoid(logits)
    return logits


# ----------------------------- param init ------------------------------------
def init_params(key):
    D, DH = EMBED_DIM, HIDDEN_DIM
    ks = jax.random.split(key, 2 + 2 * NUM_BLOCKS)

    def glorot(k, shape):
        return jax.random.normal(k, shape, jnp.float32) / jnp.sqrt(shape[0])

    def pad_mat(w):
        out = jnp.zeros((LANE, LANE), jnp.float32)
        return out.at[: w.shape[0], : w.shape[1]].set(w)

    def pad_vec(v):
        out = jnp.zeros((LANE,), jnp.float32)
        return out.at[: v.shape[0]].set(v)

    w_pe = glorot(ks[0], (CP_REAL, D))
    w1 = [glorot(ks[1 + 2 * i], (D, DH)) for i in range(NUM_BLOCKS)]
    w2 = [glorot(ks[2 + 2 * i], (DH, D)) for i in range(NUM_BLOCKS)]

    w_list = [pad_mat(w_pe)]
    for i in range(NUM_BLOCKS):
        w_list += [pad_mat(w1[i]), pad_mat(w2[i])]
    w_stack = jnp.stack(w_list).astype(jnp.bfloat16)          # (W_MATS, 128, 128)

    ones_d = pad_vec(jnp.ones((D,), jnp.float32))
    zeros = jnp.zeros((LANE,), jnp.float32)
    rows = [zeros, ones_d, zeros]                              # b_pe, g_pe, beta_pe
    for _ in range(NUM_BLOCKS):
        rows += [ones_d, zeros, zeros, zeros]                  # blk_g, blk_b, b1, b2
    rows += [ones_d, zeros]                                    # g_f, beta_f
    rows += [zeros] * (V_ROWS - len(rows))
    v_stack = jnp.stack(rows)                                  # (V_ROWS, 128) f32

    return {
        "w_stack": w_stack,
        "v_stack": v_stack,
        "w_h": glorot(ks[-1], (D, NUM_CLASSES)),
        "b_h": jnp.zeros((NUM_CLASSES,), jnp.float32),
    }


# ----------------------------- main -------------------------------------------
if __name__ == "__main__":
    key = jax.random.PRNGKey(0)
    k_a, k_b, k_p = jax.random.split(key, 3)

    B, C_each, H, W = 2, 3, 16, 16          # img_A / img_B are 3-channel; cat -> 6
    img_A = jax.random.normal(k_a, (B, C_each, H, W), jnp.float32)
    img_B = jax.random.normal(k_b, (B, C_each, H, W), jnp.float32)
    params = init_params(k_p)

    logits = discriminator_forward(img_A, img_B, params)
    jax.block_until_ready(logits)
    assert logits.shape == (B, NUM_CLASSES)
    assert bool(jnp.all(jnp.isfinite(logits)))
    print("KERNEL_OK")
</pallas_src>

<mosaic_0001>
module attributes {stable_mosaic.version = 11 : i64} {
  func.func @disc_kernel(%arg0: i32, %arg1: i32, %arg2: memref<1x16x128xbf16, #tpu.memory_space<vmem>>, %arg3: memref<5x128x128xbf16, #tpu.memory_space<vmem>>, %arg4: memref<16x128xf32, #tpu.memory_space<vmem>>, %arg5: memref<8x128xf32, #tpu.memory_space<vmem>>) attributes {dimension_semantics = [#tpu.dimension_semantics<parallel>, #tpu.dimension_semantics<arbitrary>], iteration_bounds = array<i64: 2, 1>, scalar_prefetch = 0 : i64, scratch_operands = 0 : i64, tpu.core_type = #tpu.core_type<tc>, window_params = [{transform_indices = @transform_0, window_bounds = array<i64: 1, 16, 128>}, {pipeline_mode = #tpu.pipeline_mode<synchronous>, transform_indices = @transform_1, window_bounds = array<i64: 5, 128, 128>}, {pipeline_mode = #tpu.pipeline_mode<synchronous>, transform_indices = @transform_2, window_bounds = array<i64: 16, 128>}, {transform_indices = @transform_3, window_bounds = array<i64: 8, 128>}]} {
    %c0 = arith.constant 0 : index
    %c0_0 = arith.constant 0 : index
    %0 = vector.load %arg4[%c0, %c0_0] : memref<16x128xf32, #tpu.memory_space<vmem>>, vector<16x128xf32>
    %1 = tpu.iota {dimensions = array<i32: 1>} : vector<1x128xi32>
    %c32_i32 = arith.constant 32 : i32
    %2 = vector.broadcast %c32_i32 : i32 to vector<1x128xi32>
    %3 = arith.cmpi slt, %1, %2 : vector<1x128xi32>
    %4 = arith.extui %3 : vector<1x128xi1> to vector<1x128xi32>
    %5 = arith.sitofp %4 : vector<1x128xi32> to vector<1x128xf32>
    %c0_1 = arith.constant 0 : index
    %c0_2 = arith.constant 0 : index
    %c0_3 = arith.constant 0 : index
    %6 = vector.load %arg2[%c0_1, %c0_2, %c0_3] : memref<1x16x128xbf16, #tpu.memory_space<vmem>>, vector<1x16x128xbf16>
    %7 = vector.shape_cast %6 : vector<1x16x128xbf16> to vector<16x128xbf16>
    %c0_4 = arith.constant 0 : index
    %c0_5 = arith.constant 0 : index
    %c0_6 = arith.constant 0 : index
    %8 = vector.load %arg3[%c0_4, %c0_5, %c0_6] : memref<5x128x128xbf16, #tpu.memory_space<vmem>>, vector<1x128x128xbf16>
    %9 = vector.shape_cast %8 : vector<1x128x128xbf16> to vector<128x128xbf16>
    %cst = arith.constant dense<0.000000e+00> : vector<16x128xf32>
    %10 = tpu.matmul %7, %9, %cst {dimension_numbers = #tpu.dot_dimension_numbers<[1], [0], [0], [1], [0, 0, 1, 1], [], []>} : vector<16x128xbf16>, vector<128x128xbf16>, vector<16x128xf32> -> vector<16x128xf32>
    %11 = vector.extract_strided_slice %0 {offsets = [0, 0], sizes = [1, 128], strides = [1, 1]} : vector<16x128xf32> to vector<1x128xf32>
    %12 = vector.broadcast %11 : vector<1x128xf32> to vector<16x128xf32>
    %13 = arith.addf %10, %12 : vector<16x128xf32>
    %14 = vector.extract_strided_slice %0 {offsets = [1, 0], sizes = [1, 128], strides = [1, 1]} : vector<16x128xf32> to vector<1x128xf32>
    %15 = vector.extract_strided_slice %0 {offsets = [2, 0], sizes = [1, 128], strides = [1, 1]} : vector<16x128xf32> to vector<1x128xf32>
    %cst_7 = arith.constant dense<0.000000e+00> : vector<16xf32>
    %16 = vector.multi_reduction <add>, %13, %cst_7 [1] : vector<16x128xf32> to vector<16xf32>
    %17 = vector.shape_cast %16 : vector<16xf32> to vector<16x1xf32>
    %cst_8 = arith.constant 3.125000e-02 : f32
    %18 = vector.broadcast %cst_8 : f32 to vector<16x1xf32>
    %19 = arith.mulf %17, %18 : vector<16x1xf32>
    %20 = vector.broadcast %19 : vector<16x1xf32> to vector<16x128xf32>
    %21 = arith.subf %13, %20 : vector<16x128xf32>
    %22 = vector.broadcast %5 : vector<1x128xf32> to vector<16x128xf32>
    %23 = arith.mulf %21, %22 : vector<16x128xf32>
    %24 = arith.mulf %23, %23 : vector<16x128xf32>
    %cst_9 = arith.constant dense<0.000000e+00> : vector<16xf32>
    %25 = vector.multi_reduction <add>, %24, %cst_9 [1] : vector<16x128xf32> to vector<16xf32>
    %26 = vector.shape_cast %25 : vector<16xf32> to vector<16x1xf32>
    %cst_10 = arith.constant 3.125000e-02 : f32
    %27 = vector.broadcast %cst_10 : f32 to vector<16x1xf32>
    %28 = arith.mulf %26, %27 : vector<16x1xf32>
    %cst_11 = arith.constant 9.99999974E-6 : f32
    %29 = vector.broadcast %cst_11 : f32 to vector<16x1xf32>
    %30 = arith.addf %28, %29 : vector<16x1xf32>
    %31 = math.rsqrt %30 : vector<16x1xf32>
    %32 = vector.broadcast %31 : vector<16x1xf32> to vector<16x128xf32>
    %33 = arith.mulf %23, %32 : vector<16x128xf32>
    %34 = vector.broadcast %14 : vector<1x128xf32> to vector<16x128xf32>
    %35 = arith.mulf %33, %34 : vector<16x128xf32>
    %36 = vector.broadcast %15 : vector<1x128xf32> to vector<16x128xf32>
    %37 = arith.addf %35, %36 : vector<16x128xf32>
    %38 = vector.extract_strided_slice %0 {offsets = [3, 0], sizes = [1, 128], strides = [1, 1]} : vector<16x128xf32> to vector<1x128xf32>
    %39 = vector.extract_strided_slice %0 {offsets = [4, 0], sizes = [1, 128], strides = [1, 1]} : vector<16x128xf32> to vector<1x128xf32>
    %cst_12 = arith.constant dense<0.000000e+00> : vector<16xf32>
    %40 = vector.multi_reduction <add>, %37, %cst_12 [1] : vector<16x128xf32> to vector<16xf32>
    %41 = vector.shape_cast %40 : vector<16xf32> to vector<16x1xf32>
    %cst_13 = arith.constant 3.125000e-02 : f32
    %42 = vector.broadcast %cst_13 : f32 to vector<16x1xf32>
    %43 = arith.mulf %41, %42 : vector<16x1xf32>
    %44 = vector.broadcast %43 : vector<16x1xf32> to vector<16x128xf32>
    %45 = arith.subf %37, %44 : vector<16x128xf32>
    %46 = vector.broadcast %5 : vector<1x128xf32> to vector<16x128xf32>
    %47 = arith.mulf %45, %46 : vector<16x128xf32>
    %48 = arith.mulf %47, %47 : vector<16x128xf32>
    %cst_14 = arith.constant dense<0.000000e+00> : vector<16xf32>
    %49 = vector.multi_reduction <add>, %48, %cst_14 [1] : vector<16x128xf32> to vector<16xf32>
    %50 = vector.shape_cast %49 : vector<16xf32> to vector<16x1xf32>
    %cst_15 = arith.constant 3.125000e-02 : f32
    %51 = vector.broadcast %cst_15 : f32 to vector<16x1xf32>
    %52 = arith.mulf %50, %51 : vector<16x1xf32>
    %cst_16 = arith.constant 9.99999974E-6 : f32
    %53 = vector.broadcast %cst_16 : f32 to vector<16x1xf32>
    %54 = arith.addf %52, %53 : vector<16x1xf32>
    %55 = math.rsqrt %54 : vector<16x1xf32>
    %56 = vector.broadcast %55 : vector<16x1xf32> to vector<16x128xf32>
    %57 = arith.mulf %47, %56 : vector<16x128xf32>
    %58 = vector.broadcast %38 : vector<1x128xf32> to vector<16x128xf32>
    %59 = arith.mulf %57, %58 : vector<16x128xf32>
    %60 = vector.broadcast %39 : vector<1x128xf32> to vector<16x128xf32>
    %61 = arith.addf %59, %60 : vector<16x128xf32>
    %62 = arith.truncf %61 : vector<16x128xf32> to vector<16x128xbf16>
    %c1 = arith.constant 1 : index
    %c0_17 = arith.constant 0 : index
    %c0_18 = arith.constant 0 : index
    %63 = vector.load %arg3[%c1, %c0_17, %c0_18] : memref<5x128x128xbf16, #tpu.memory_space<vmem>>, vector<1x128x128xbf16>
    %64 = vector.shape_cast %63 : vector<1x128x128xbf16> to vector<128x128xbf16>
    %cst_19 = arith.constant dense<0.000000e+00> : vector<16x128xf32>
    %65 = tpu.matmul %62, %64, %cst_19 {dimension_numbers = #tpu.dot_dimension_numbers<[1], [0], [0], [1], [0, 0, 1, 1], [], []>} : vector<16x128xbf16>, vector<128x128xbf16>, vector<16x128xf32> -> vector<16x128xf32>
    %66 = vector.extract_strided_slice %0 {offsets = [5, 0], sizes = [1, 128], strides = [1, 1]} : vector<16x128xf32> to vector<1x128xf32>
    %67 = vector.broadcast %66 : vector<1x128xf32> to vector<16x128xf32>
    %68 = arith.addf %65, %67 : vector<16x128xf32>
    %69 = arith.negf %68 : vector<16x128xf32>
    %70 = math.exp %69 : vector<16x128xf32>
    %cst_20 = arith.constant 1.000000e+00 : f32
    %71 = vector.broadcast %cst_20 : f32 to vector<16x128xf32>
    %72 = arith.addf %71, %70 : vector<16x128xf32>
    %73 = arith.divf %71, %72 : vector<16x128xf32>
    %74 = arith.mulf %68, %73 : vector<16x128xf32>
    %75 = arith.truncf %74 : vector<16x128xf32> to vector<16x128xbf16>
    %c2 = arith.constant 2 : index
    %c0_21 = arith.constant 0 : index
    %c0_22 = arith.constant 0 : index
    %76 = vector.load %arg3[%c2, %c0_21, %c0_22] : memref<5x128x128xbf16, #tpu.memory_space<vmem>>, vector<1x128x128xbf16>
    %77 = vector.shape_cast %76 : vector<1x128x128xbf16> to vector<128x128xbf16>
    %cst_23 = arith.constant dense<0.000000e+00> : vector<16x128xf32>
    %78 = tpu.matmul %75, %77, %cst_23 {dimension_numbers = #tpu.dot_dimension_numbers<[1], [0], [0], [1], [0, 0, 1, 1], [], []>} : vector<16x128xbf16>, vector<128x128xbf16>, vector<16x128xf32> -> vector<16x128xf32>
    %79 = vector.extract_strided_slice %0 {offsets = [6, 0], sizes = [1, 128], strides = [1, 1]} : vector<16x128xf32> to vector<1x128xf32>
    %80 = vector.broadcast %79 : vector<1x128xf32> to vector<16x128xf32>
    %81 = arith.addf %78, %80 : vector<16x128xf32>
    %82 = arith.addf %37, %81 : vector<16x128xf32>
    %83 = vector.extract_strided_slice %0 {offsets = [7, 0], sizes = [1, 128], strides = [1, 1]} : vector<16x128xf32> to vector<1x128xf32>
    %84 = vector.extract_strided_slice %0 {offsets = [8, 0], sizes = [1, 128], strides = [1, 1]} : vector<16x128xf32> to vector<1x128xf32>
    %cst_24 = arith.constant dense<0.000000e+00> : vector<16xf32>
    %85 = vector.multi_reduction <add>, %82, %cst_24 [1] : vector<16x128xf32> to vector<16xf32>
    %86 = vector.shape_cast %85 : vector<16xf32> to vector<16x1xf32>
    %cst_25 = arith.constant 3.125000e-02 : f32
    %87 = vector.broadcast %cst_25 : f32 to vector<16x1xf32>
    %88 = arith.mulf %86, %87 : vector<16x1xf32>
    %89 = vector.broadcast %88 : vector<16x1xf32> to vector<16x128xf32>
    %90 = arith.subf %82, %89 : vector<16x128xf32>
    %91 = vector.broadcast %5 : vector<1x128xf32> to vector<16x128xf32>
    %92 = arith.mulf %90, %91 : vector<16x128xf32>
    %93 = arith.mulf %92, %92 : vector<16x128xf32>
    %cst_26 = arith.constant dense<0.000000e+00> : vector<16xf32>
    %94 = vector.multi_reduction <add>, %93, %cst_26 [1] : vector<16x128xf32> to vector<16xf32>
    %95 = vector.shape_cast %94 : vector<16xf32> to vector<16x1xf32>
    %cst_27 = arith.constant 3.125000e-02 : f32
    %96 = vector.broadcast %cst_27 : f32 to vector<16x1xf32>
    %97 = arith.mulf %95, %96 : vector<16x1xf32>
    %cst_28 = arith.constant 9.99999974E-6 : f32
    %98 = vector.broadcast %cst_28 : f32 to vector<16x1xf32>
    %99 = arith.addf %97, %98 : vector<16x1xf32>
    %100 = math.rsqrt %99 : vector<16x1xf32>
    %101 = vector.broadcast %100 : vector<16x1xf32> to vector<16x128xf32>
    %102 = arith.mulf %92, %101 : vector<16x128xf32>
    %103 = vector.broadcast %83 : vector<1x128xf32> to vector<16x128xf32>
    %104 = arith.mulf %102, %103 : vector<16x128xf32>
    %105 = vector.broadcast %84 : vector<1x128xf32> to vector<16x128xf32>
    %106 = arith.addf %104, %105 : vector<16x128xf32>
    %107 = arith.truncf %106 : vector<16x128xf32> to vector<16x128xbf16>
    %c3 = arith.constant 3 : index
    %c0_29 = arith.constant 0 : index
    %c0_30 = arith.constant 0 : index
    %108 = vector.load %arg3[%c3, %c0_29, %c0_30] : memref<5x128x128xbf16, #tpu.memory_space<vmem>>, vector<1x128x128xbf16>
    %109 = vector.shape_cast %108 : vector<1x128x128xbf16> to vector<128x128xbf16>
    %cst_31 = arith.constant dense<0.000000e+00> : vector<16x128xf32>
    %110 = tpu.matmul %107, %109, %cst_31 {dimension_numbers = #tpu.dot_dimension_numbers<[1], [0], [0], [1], [0, 0, 1, 1], [], []>} : vector<16x128xbf16>, vector<128x128xbf16>, vector<16x128xf32> -> vector<16x128xf32>
    %111 = vector.extract_strided_slice %0 {offsets = [9, 0], sizes = [1, 128], strides = [1, 1]} : vector<16x128xf32> to vector<1x128xf32>
    %112 = vector.broadcast %111 : vector<1x128xf32> to vector<16x128xf32>
    %113 = arith.addf %110, %112 : vector<16x128xf32>
    %114 = arith.negf %113 : vector<16x128xf32>
    %115 = math.exp %114 : vector<16x128xf32>
    %cst_32 = arith.constant 1.000000e+00 : f32
    %116 = vector.broadcast %cst_32 : f32 to vector<16x128xf32>
    %117 = arith.addf %116, %115 : vector<16x128xf32>
    %118 = arith.divf %116, %117 : vector<16x128xf32>
    %119 = arith.mulf %113, %118 : vector<16x128xf32>
    %120 = arith.truncf %119 : vector<16x128xf32> to vector<16x128xbf16>
    %c4 = arith.constant 4 : index
    %c0_33 = arith.constant 0 : index
    %c0_34 = arith.constant 0 : index
    %121 = vector.load %arg3[%c4, %c0_33, %c0_34] : memref<5x128x128xbf16, #tpu.memory_space<vmem>>, vector<1x128x128xbf16>
    %122 = vector.shape_cast %121 : vector<1x128x128xbf16> to vector<128x128xbf16>
    %cst_35 = arith.constant dense<0.000000e+00> : vector<16x128xf32>
    %123 = tpu.matmul %120, %122, %cst_35 {dimension_numbers = #tpu.dot_dimension_numbers<[1], [0], [0], [1], [0, 0, 1, 1], [], []>} : vector<16x128xbf16>, vector<128x128xbf16>, vector<16x128xf32> -> vector<16x128xf32>
    %124 = vector.extract_strided_slice %0 {offsets = [10, 0], sizes = [1, 128], strides = [1, 1]} : vector<16x128xf32> to vector<1x128xf32>
    %125 = vector.broadcast %124 : vector<1x128xf32> to vector<16x128xf32>
    %126 = arith.addf %123, %125 : vector<16x128xf32>
    %127 = arith.addf %82, %126 : vector<16x128xf32>
    %128 = vector.extract_strided_slice %0 {offsets = [11, 0], sizes = [1, 128], strides = [1, 1]} : vector<16x128xf32> to vector<1x128xf32>
    %129 = vector.extract_strided_slice %0 {offsets = [12, 0], sizes = [1, 128], strides = [1, 1]} : vector<16x128xf32> to vector<1x128xf32>
    %cst_36 = arith.constant dense<0.000000e+00> : vector<16xf32>
    %130 = vector.multi_reduction <add>, %127, %cst_36 [1] : vector<16x128xf32> to vector<16xf32>
    %131 = vector.shape_cast %130 : vector<16xf32> to vector<16x1xf32>
    %cst_37 = arith.constant 3.125000e-02 : f32
    %132 = vector.broadcast %cst_37 : f32 to vector<16x1xf32>
    %133 = arith.mulf %131, %132 : vector<16x1xf32>
    %134 = vector.broadcast %133 : vector<16x1xf32> to vector<16x128xf32>
    %135 = arith.subf %127, %134 : vector<16x128xf32>
    %136 = vector.broadcast %5 : vector<1x128xf32> to vector<16x128xf32>
    %137 = arith.mulf %135, %136 : vector<16x128xf32>
    %138 = arith.mulf %137, %137 : vector<16x128xf32>
    %cst_38 = arith.constant dense<0.000000e+00> : vector<16xf32>
    %139 = vector.multi_reduction <add>, %138, %cst_38 [1] : vector<16x128xf32> to vector<16xf32>
    %140 = vector.shape_cast %139 : vector<16xf32> to vector<16x1xf32>
    %cst_39 = arith.constant 3.125000e-02 : f32
    %141 = vector.broadcast %cst_39 : f32 to vector<16x1xf32>
    %142 = arith.mulf %140, %141 : vector<16x1xf32>
    %cst_40 = arith.constant 9.99999974E-6 : f32
    %143 = vector.broadcast %cst_40 : f32 to vector<16x1xf32>
    %144 = arith.addf %142, %143 : vector<16x1xf32>
    %145 = math.rsqrt %144 : vector<16x1xf32>
    %146 = vector.broadcast %145 : vector<16x1xf32> to vector<16x128xf32>
    %147 = arith.mulf %137, %146 : vector<16x128xf32>
    %148 = vector.broadcast %128 : vector<1x128xf32> to vector<16x128xf32>
    %149 = arith.mulf %147, %148 : vector<16x128xf32>
    %150 = vector.broadcast %129 : vector<1x128xf32> to vector<16x128xf32>
    %151 = arith.addf %149, %150 : vector<16x128xf32>
    %c0_i32 = arith.constant 0 : i32
    %152 = arith.cmpi eq, %arg1, %c0_i32 : i32
    %153 = arith.extui %152 : i1 to i32
    %c0_i32_41 = arith.constant 0 : i32
    %154 = arith.cmpi ne, %153, %c0_i32_41 : i32
    scf.if %154 {
      %cst_49 = arith.constant 0.000000e+00 : f32
      %165 = vector.broadcast %cst_49 : f32 to vector<8x128xf32>
      %c0_50 = arith.constant 0 : index
      %c0_51 = arith.constant 0 : index
      %166 = vector.load %arg5[%c0_50, %c0_51] : memref<8x128xf32, #tpu.memory_space<vmem>>, vector<8x128xf32>
      tpu.vector_store %arg5[%c0_50, %c0_51], %165 {strides = array<i32>} : memref<8x128xf32, #tpu.memory_space<vmem>>, vector<8x128xf32>,
    } else {
    }
    %cst_42 = arith.constant dense<0.000000e+00> : vector<128xf32>
    %155 = vector.multi_reduction <add>, %151, %cst_42 [0] : vector<16x128xf32> to vector<128xf32>
    %156 = vector.shape_cast %155 : vector<128xf32> to vector<1x128xf32>
    %c0_43 = arith.constant 0 : index
    %c0_44 = arith.constant 0 : index
    %157 = vector.load %arg5[%c0_43, %c0_44] : memref<8x128xf32, #tpu.memory_space<vmem>>, vector<8x128xf32>
    %158 = vector.shape_cast %156 : vector<1x128xf32> to vector<1x128xf32>
    %159 = vector.broadcast %158 : vector<1x128xf32> to vector<8x128xf32>
    %160 = arith.addf %157, %159 : vector<8x128xf32>
    %c0_45 = arith.constant 0 : index
    %c0_46 = arith.constant 0 : index
    %161 = vector.load %arg5[%c0_45, %c0_46] : memref<8x128xf32, #tpu.memory_space<vmem>>, vector<8x128xf32>
    tpu.vector_store %arg5[%c0_45, %c0_46], %160 {strides = array<i32>} : memref<8x128xf32, #tpu.memory_space<vmem>>, vector<8x128xf32>,
    %c0_i32_47 = arith.constant 0 : i32
    %162 = arith.cmpi eq, %arg1, %c0_i32_47 : i32
    %163 = arith.extui %162 : i1 to i32
    %c0_i32_48 = arith.constant 0 : i32
    %164 = arith.cmpi ne, %163, %c0_i32_48 : i32
    scf.if %164 {
      %c0_49 = arith.constant 0 : index
      %c0_50 = arith.constant 0 : index
      %165 = vector.load %arg5[%c0_49, %c0_50] : memref<8x128xf32, #tpu.memory_space<vmem>>, vector<8x128xf32>
      %cst_51 = arith.constant 6.250000e-02 : f32
      %166 = vector.broadcast %cst_51 : f32 to vector<8x128xf32>
      %167 = arith.mulf %165, %166 : vector<8x128xf32>
      %c0_52 = arith.constant 0 : index
      %c0_53 = arith.constant 0 : index
      %168 = vector.load %arg5[%c0_52, %c0_53] : memref<8x128xf32, #tpu.memory_space<vmem>>, vector<8x128xf32>
      tpu.vector_store %arg5[%c0_52, %c0_53], %167 {strides = array<i32>} : memref<8x128xf32, #tpu.memory_space<vmem>>, vector<8x128xf32>,
    } else {
    }
    return
  }
  func.func @transform_0(%arg0: i32, %arg1: i32) -> (i32, i32, i32) {
    %c0_i32 = arith.constant 0 : i32
    %c0_i32_0 = arith.constant 0 : i32
    return %arg0, %arg1, %c0_i32 : i32, i32, i32
  }
  func.func @transform_1(%arg0: i32, %arg1: i32) -> (i32, i32, i32) {
    %c0_i32 = arith.constant 0 : i32
    %c0_i32_0 = arith.constant 0 : i32
    %c0_i32_1 = arith.constant 0 : i32
    %c0_i32_2 = arith.constant 0 : i32
    return %c0_i32, %c0_i32_0, %c0_i32_1 : i32, i32, i32
  }
  func.func @transform_2(%arg0: i32, %arg1: i32) -> (i32, i32) {
    %c0_i32 = arith.constant 0 : i32
    %c0_i32_0 = arith.constant 0 : i32
    %c0_i32_1 = arith.constant 0 : i32
    return %c0_i32, %c0_i32_0 : i32, i32
  }
  func.func @transform_3(%arg0: i32, %arg1: i32) -> (i32, i32) {
    %c0_i32 = arith.constant 0 : i32
    %c0_i32_0 = arith.constant 0 : i32
    return %arg0, %c0_i32 : i32, i32
  }
}

</mosaic_0001>

<bundles_post_ra>
// kernel: discriminator_forward.1
= control target key start
LH: loop header
LB: loop body
LE: loop exit
PB: predicated region body
PF: predicated region fallthrough
CT: control target
= control target key end

     0   :  { %s1441_s12 = smov 0   ;;  %s1443_s13 = smov 0   ;;  %s1735_s0 = inlined_call_operand.vmem [shape: bf16[2,16,128], index: 0, kind: input, shape index: {}]   ;;  %s1736_s1 = inlined_call_operand.vmem [shape: bf16[5,128,128], index: 1, kind: input, shape index: {}]   ;;  %s1737_s2 = inlined_call_operand.vmem [shape: f32[16,128], index: 2, kind: input, shape index: {}]   ;;  %s1738_s3 = inlined_call_operand.vmem [shape: f32[16,128], index: 3, kind: output, shape index: {}]  }
   0x1   :  { %s1445_s14 = smov 0  }
   0x2 LB: > { %s25_s15 = sadd.s32 1, %s1413_s13  ;;  %p1034_p0 = scmp.ge.s32.totalorder %s1417_s14, 1  ;;  %s1417_s14 = sphi %s1445_s14, %s13_s14   ;;  %s1413_s13 = sphi %s1443_s13, %s1740_s13   ;;  %s1409_s12 = sphi %s1441_s12, %s1739_s12  }
   0x3   : > { %p27_p1 = scmp.ge.s32.totalorder %s25_s15, 2  ;;  %p156_p2 = scmp.lt.s32.totalorder %s1417_s14, 3 }
   0x5   : > { %s1742_s15 = smov (%p27_p1, %s25_s15), 0  ;;  %p157_p3 = pnand %p1034_p0, %p156_p2 }
   0x6   : > { %p184_p4 = scmp.lt.s32.totalorder (!%p157_p3), %s1409_s12, 1 }
   0x7   : > { %160 = sbr.rel (%p157_p3) target bundleno = 2369 (0x941), region = 32 }
   0xc   : > { %v1322_v0 = vld [vmem:[%s1736_s1 + $0x38] sm:$0xff]   ;;  %v1419_v1 = vmov 0.0   ;;  %v1323_v2 = vld [vmem:[%s1736_s1 + $0x30] sm:$0xff]   ;;  %vm1420_vm0 = vmmov 0   ;;  %s1744_s12 = smov (!%p184_p4, %s1409_s12), 1  ;;  %v1324_v3 = vld [vmem:[%s1736_s1 + $0x28] sm:$0xff]   ;;  %v200_v10 = vlaneseq }
   0xd   : > { %1196 = vmatprep.subr.bf16.mxu0 %v1419_v1  ;;  %1216 = vmatprep.subr.bf16.mxu1 %v1419_v1  ;;  %s1150_s22 = sshll.u32 %s1744_s12, 3  ;;  %v1325_v4 = vld [vmem:[%s1736_s1 + $0x20] sm:$0xff]   ;;  %v1326_v5 = vld [vmem:[%s1736_s1 + $0x18] sm:$0xff]   ;;  %v1327_v6 = vld [vmem:[%s1736_s1 + $0x10] sm:$0xff]  }
   0xe   : > { %1197 = vmatpush3.bf16.msra.mxu0 %v1322_v0  ;;  %1212 = vmatprep.mubr.msk.bf16.mxu0 %vm1420_vm0, %v1419_v1  ;;  %s191_s25 = scalar_lea.vmem %s1735_s0, %s1150_s22  ;;  %v1328_v7 = vld [vmem:[%s1736_s1 + $0x8] sm:$0xff]   ;;  %v1329_v8 = vld [vmem:[%s1736_s1] sm:$0xff]   ;;  %v1507_v11 = vshrl.u32 %v200_v10, 7  ;;  %v201_v21 = vand.u32 127, %v200_v10  ;;  %v1331_v51 = vld [vmem:[%s1736_s1 + $0x78] sm:$0xff]   ;;  %s196_s17 = scalar_lea.vmem %s1738_s3, %s1150_s22 }
   0xf   : > { %1198 = vmatprep.subr.bf16.mxu0 %v1419_v1  ;;  %1232 = vmatprep.mubr.msk.bf16.mxu1 %vm1420_vm0, %v1419_v1  ;;  %v1330_v9 = vld [vmem:[%s191_s25] sm:$0xff]   ;;  %v1332_v62 = vld [vmem:[%s1736_s1 + $0x70] sm:$0xff]   ;;  %v1333_v63 = vld [vmem:[%s1736_s1 + $0x68] sm:$0xff]  }
  0x10   : > { %v225_v12 = vsub.s32 0, %v1507_v11  ;;  %v1513_v13 = vld [vmem:[%s1737_s2] sm:$0xff]  ;;  %vm202_vm1 = vcmp.lt.s32.totalorder %v201_v21, 32  ;;  %v348_v39 = vsub.s32 1, %v1507_v11  ;;  %v354_v40 = vsub.s32 2, %v1507_v11  ;;  %1217 = vmatpush3.bf16.msra.mxu1 %v1331_v51 }
  0x11   : > { %v1519_v24 = vsel %vm202_vm1, 1.0, %v1419_v1  ;;  %1218 = vmatprep.subr.bf16.mxu1 %v1419_v1  ;;  %v1334_v0 = vld [vmem:[%s1736_s1 + $0x60] sm:$0xff]  }
  0x12   : > { %1199 = vmatpush3.bf16.msra.mxu0 %v1323_v2  ;;  %v226_v14 = vrot.slane %v1513_v13, %v225_v12  ;;  %v349_v41 = vrot.slane %v1513_v13, %v348_v39  ;;  %v355_v44 = vrot.slane %v1513_v13, %v354_v40  ;;  %v1335_v2 = vld [vmem:[%s1736_s1 + $0x58] sm:$0xff]  }
  0x13   : > { %1200 = vmatprep.subr.bf16.mxu0 %v1419_v1 }
  0x14   : > { %1219 = vmatpush3.bf16.msra.mxu1 %v1332_v62 }
  0x15   : > { %1220 = vmatprep.subr.bf16.mxu1 %v1419_v1 }
  0x16   : > { %1201 = vmatpush3.bf16.msra.mxu0 %v1324_v3  ;;  %v1336_v3 = vld [vmem:[%s1736_s1 + $0x50] sm:$0xff]  }
  0x17   : > { %1202 = vmatprep.subr.bf16.mxu0 %v1419_v1 }
  0x18   : > { %1221 = vmatpush3.bf16.msra.mxu1 %v1333_v63 }
  0x19   : > { %1222 = vmatprep.subr.bf16.mxu1 %v1419_v1 }
  0x1a   : > { %1203 = vmatpush3.bf16.msra.mxu0 %v1325_v4  ;;  %v1337_v4 = vld [vmem:[%s1736_s1 + $0x48] sm:$0xff]  }
  0x1b   : > { %1204 = vmatprep.subr.bf16.mxu0 %v1419_v1 }
  0x1c   : > { %1223 = vmatpush3.bf16.msra.mxu1 %v1334_v0 }
  0x1d   : > { %1224 = vmatprep.subr.bf16.mxu1 %v1419_v1 }
  0x1e   : > { %1205 = vmatpush3.bf16.msra.mxu0 %v1326_v5  ;;  %v1338_v5 = vld [vmem:[%s1736_s1 + $0x40] sm:$0xff]  }
  0x1f   : > { %1206 = vmatprep.subr.bf16.mxu0 %v1419_v1 }
  0x20   : > { %1225 = vmatpush3.bf16.msra.mxu1 %v1335_v2 }
  0x21   : > { %1226 = vmatprep.subr.bf16.mxu1 %v1419_v1 }
  0x22   : > { %1207 = vmatpush3.bf16.msra.mxu0 %v1327_v6 }
  0x23   : > { %1208 = vmatprep.subr.bf16.mxu0 %v1419_v1 }
  0x24   : > { %1227 = vmatpush3.bf16.msra.mxu1 %v1336_v3 }
  0x25   : > { %1228 = vmatprep.subr.bf16.mxu1 %v1419_v1 }
  0x26   : > { %1209 = vmatpush3.bf16.msra.mxu0 %v1328_v7 }
  0x27   : > { %1210 = vmatprep.subr.bf16.mxu0 %v1419_v1 }
  0x28   : > { %1229 = vmatpush3.bf16.msra.mxu1 %v1337_v4 }
  0x29   : > { %1230 = vmatprep.subr.bf16.mxu1 %v1419_v1 }
  0x2a   : > { %1211 = vmatpush3.bf16.msra.mxu0 %v1329_v8 }
  0x2b   : > { %1236 = vmatprep.subr.bf16.mxu0 %v1419_v1 }
  0x2c   : > { %1231 = vmatpush3.bf16.msra.mxu1 %v1338_v5 }
  0x2d   : > { %1213 = vmatmul.mubr.bf16.vlgmr.msra.gmra.mxu0 %v1330_v9  ;;  %1256 = vmatprep.subr.bf16.mxu1 %v1419_v1 }
  0x2e   : > { %1252 = vmatprep.mubr.msk.bf16.mxu0 %vm1420_vm0, %v1419_v1 }
  0xed   : > { %v315_v15 = vpop.f32.mrf.mxu0 }
  0xee   : > { %v316_v16 = vadd.f32 %v315_v15, %v226_v14  ;;  %v384_v15 = vsub.s32 3, %v1507_v11 }
  0xef   : > { %v1214_v17 = vpop.f32.mrf.mxu0 }
  0xf0   : > { %322 = vadd.xlane.f32.xlu0 %v316_v16 }
  0xf1   : > { %v318_v18 = vpop.f32.mrf.mxu0 }
  0xf2   : > { %v319_v19 = vadd.f32 %v318_v18, %v226_v14  ;;  %v385_v18 = vrot.slane %v1513_v13, %v384_v15 }
  0xf3   : > { %v1215_v20 = vpop.f32.mrf.mxu0 }
  0xf4   : > { %324 = vadd.xlane.f32.xlu0 %v319_v19 }
 0x179   : > { %v323_v22 = vpop.xlane.xlu0 %322 }
 0x17a   : > { %v326_v23 = vmul.f32 0.03125, %v323_v22 }
 0x17c   : > { %v328_v25 = vsub.f32 %v316_v16, %v326_v23 }
 0x17d   : > { %v325_v26 = vpop.xlane.xlu0 %324 }
 0x17e   : > { %v327_v27 = vmul.f32 0.03125, %v325_v26  ;;  %v330_v28 = vmul.f32 %v1519_v24, %v328_v25 }
 0x180   : > { %v329_v29 = vsub.f32 %v319_v19, %v327_v27  ;;  %v332_v30 = vmul.f32 %v330_v28, %v330_v28  ;;  %v390_v19 = vsub.s32 4, %v1507_v11 }
 0x182   : > { %334 = vadd.xlane.f32.xlu1 %v332_v30  ;;  %v331_v31 = vmul.f32 %v1519_v24, %v329_v29  ;;  %v391_v23 = vrot.slane %v1513_v13, %v390_v19  ;;  %v1339_v29 = vld [vmem:[%s1736_s1 + $0xb8] sm:$0xff]   ;;  %v1340_v30 = vld [vmem:[%s1736_s1 + $0xb0] sm:$0xff]  }
 0x183   : > { %1237 = vmatpush3.bf16.msra.mxu0 %v1339_v29 }
 0x184   : > { %v333_v32 = vmul.f32 %v331_v31, %v331_v31  ;;  %1238 = vmatprep.subr.bf16.mxu0 %v1419_v1 }
 0x186   : > { %336 = vadd.xlane.f32.xlu1 %v333_v32  ;;  %v1342_v32 = vld [vmem:[%s1736_s1 + $0xa0] sm:$0xff]  }
 0x187   : > { %1239 = vmatpush3.bf16.msra.mxu0 %v1340_v30 }
 0x188   : > { %1240 = vmatprep.subr.bf16.mxu0 %v1419_v1 }
 0x20b   : > { %v335_v33 = vpop.xlane.xlu1 %334 }
 0x20c   : > { %v338_v34 = vmul.f32 0.03125, %v335_v33  ;;  %v1343_v33 = vld [vmem:[%s1736_s1 + $0x98] sm:$0xff]  }
 0x20e   : > { %v340_v35 = vadd.f32 1e-05, %v338_v34  ;;  %v1344_v34 = vld [vmem:[%s1736_s1 + $0x90] sm:$0xff]  }
 0x20f   : > { %v337_v36 = vpop.xlane.xlu1 %336 }
 0x210   : > { %1363 = vrsqrt.f32 %v340_v35  ;;  %v339_v37 = vmul.f32 0.03125, %v337_v36  ;;  %v1345_v35 = vld [vmem:[%s1736_s1 + $0x88] sm:$0xff]   ;;  %v1346_v36 = vld [vmem:[%s1736_s1 + $0x80] sm:$0xff]  }
 0x212   : > { %v341_v38 = vadd.f32 1e-05, %v339_v37  ;;  %v414_v37 = vsub.s32 5, %v1507_v11 }
 0x214   : > { %1365 = vrsqrt.f32 %v341_v38  ;;  %v415_v38 = vrot.slane %v1513_v13, %v414_v37 }
 0x21d   : > { %v1364_v42 = vpop.eup %1363 }
 0x21e   : > { %v344_v43 = vmul.f32 %v1364_v42, %v330_v28 }
 0x220   : > { %v350_v45 = vmul.f32 %v349_v41, %v344_v43 }
 0x221   : > { %v1366_v46 = vpop.eup %1365 }
 0x222   : > { %v1531_v47 = vadd.f32 %v355_v44, %v350_v45  ;;  %v345_v48 = vmul.f32 %v1366_v46, %v331_v31  ;;  %v1341_v31 = vld [vmem:[%s1736_s1 + $0xa8] sm:$0xff]  }
 0x223   : > { %1241 = vmatpush3.bf16.msra.mxu0 %v1341_v31 }
 0x224   : > { %358 = vadd.xlane.f32.xlu0 %v1531_v47  ;;  %v351_v49 = vmul.f32 %v349_v41, %v345_v48  ;;  %1242 = vmatprep.subr.bf16.mxu0 %v1419_v1 }
 0x226   : > { %v1534_v50 = vadd.f32 %v355_v44, %v351_v49 }
 0x227   : > { %1243 = vmatpush3.bf16.msra.mxu0 %v1342_v32 }
 0x228   : > { %360 = vadd.xlane.f32.xlu1 %v1534_v50  ;;  %1244 = vmatprep.subr.bf16.mxu0 %v1419_v1 }
 0x22b   : > { %1245 = vmatpush3.bf16.msra.mxu0 %v1343_v33 }
 0x22c   : > { %1246 = vmatprep.subr.bf16.mxu0 %v1419_v1 }
 0x22f   : > { %1247 = vmatpush3.bf16.msra.mxu0 %v1344_v34 }
 0x230   : > { %1248 = vmatprep.subr.bf16.mxu0 %v1419_v1 }
 0x233   : > { %1249 = vmatpush3.bf16.msra.mxu0 %v1345_v35  ;;  %v658_v35 = vsub.s32 7, %v1507_v11 }
 0x234   : > { %1250 = vmatprep.subr.bf16.mxu0 %v1419_v1 }
 0x237   : > { %1251 = vmatpush3.bf16.msra.mxu0 %v1346_v36 }
 0x238   : > { %1276 = vmatprep.subr.bf16.mxu0 %v1419_v1 }
 0x2ad   : > { %v359_v52 = vpop.xlane.xlu0 %358 }
 0x2ae   : > { %v362_v53 = vmul.f32 0.03125, %v359_v52 }
 0x2b0   : > { %v364_v54 = vsub.f32 %v1531_v47, %v362_v53 }
 0x2b1   : > { %v361_v55 = vpop.xlane.xlu1 %360 }
 0x2b2   : > { %v363_v56 = vmul.f32 0.03125, %v361_v55  ;;  %v366_v57 = vmul.f32 %v1519_v24, %v364_v54 }
 0x2b4   : > { %v365_v58 = vsub.f32 %v1534_v50, %v363_v56  ;;  %v368_v59 = vmul.f32 %v366_v57, %v366_v57 }
 0x2b6   : > { %370 = vadd.xlane.f32.xlu0 %v368_v59  ;;  %v367_v60 = vmul.f32 %v1519_v24, %v365_v58 }
 0x2b8   : > { %v369_v61 = vmul.f32 %v367_v60, %v367_v60 }
 0x2ba   : > { %372 = vadd.xlane.f32.xlu1 %v369_v61 }
 0x33f   : > { %v371_v6 = vpop.xlane.xlu0 %370 }
 0x340   : > { %v374_v7 = vmul.f32 0.03125, %v371_v6 }
 0x342   : > { %v376_v8 = vadd.f32 1e-05, %v374_v7  ;;  %v1347_v7 = vld [vmem:[%s1736_s1 + $0xf8] sm:$0xff]  }
 0x343   : > { %v373_v9 = vpop.xlane.xlu1 %372 }
 0x344   : > { %1367 = vrsqrt.f32 %v376_v8  ;;  %v375_v10 = vmul.f32 0.03125, %v373_v9 }
 0x346   : > { %v377_v14 = vadd.f32 1e-05, %v375_v10 }
 0x348   : > { %1369 = vrsqrt.f32 %v377_v14 }
 0x351   : > { %v1368_v16 = vpop.eup %1367 }
 0x352   : > { %v380_v17 = vmul.f32 %v1368_v16, %v366_v57 }
 0x354   : > { %v386_v22 = vmul.f32 %v385_v18, %v380_v17 }
 0x355   : > { %v1370_v20 = vpop.eup %1369 }
 0x356   : > { %v381_v21 = vmul.f32 %v1370_v20, %v367_v60  ;;  %v392_v26 = vadd.f32 %v391_v23, %v386_v22  ;;  %v539_v60 = vsub.s32 6, %v1507_v11  ;;  %v1349_v22 = vld [vmem:[%s1736_s1 + $0xe8] sm:$0xff]  }
 0x358   : > { %v387_v25 = vmul.f32 %v385_v18, %v381_v21  ;;  %v540_v61 = vrot.slane %v1513_v13, %v539_v60  ;;  %v1348_v21 = vld [vmem:[%s1736_s1 + $0xf0] sm:$0xff]  }
 0x35a   : > { %v393_v27 = vadd.f32 %v391_v23, %v387_v25  ;;  %v1350_v23 = vld [vmem:[%s1736_s1 + $0xe0] sm:$0xff]   ;;  %v1351_v25 = vld [vmem:[%s1736_s1 + $0xd8] sm:$0xff]  }
 0x35c   : > { %v394_v28 = vpack.c.bf16 %v393_v27, %v392_v26  ;;  %v1352_v26 = vld [vmem:[%s1736_s1 + $0xd0] sm:$0xff]   ;;  %v1353_v27 = vld [vmem:[%s1736_s1 + $0xc8] sm:$0xff]  }
 0x35e   : > { %1233 = vmatmul.mubr.bf16.vlgmr.msra.gmra.mxu1 %v394_v28  ;;  %v1354_v28 = vld [vmem:[%s1736_s1 + $0xc0] sm:$0xff]  }
 0x35f   : > { %1272 = vmatprep.mubr.msk.bf16.mxu1 %vm1420_vm0, %v1419_v1  ;;  %1257 = vmatpush3.bf16.msra.mxu1 %v1347_v7 }
 0x360   : > { %1258 = vmatprep.subr.bf16.mxu1 %v1419_v1 }
 0x363   : > { %1259 = vmatpush3.bf16.msra.mxu1 %v1348_v21 }
 0x364   : > { %1260 = vmatprep.subr.bf16.mxu1 %v1419_v1 }
 0x367   : > { %1261 = vmatpush3.bf16.msra.mxu1 %v1349_v22 }
 0x368   : > { %1262 = vmatprep.subr.bf16.mxu1 %v1419_v1 }
 0x36b   : > { %1263 = vmatpush3.bf16.msra.mxu1 %v1350_v23 }
 0x36c   : > { %1264 = vmatprep.subr.bf16.mxu1 %v1419_v1 }
 0x36f   : > { %1265 = vmatpush3.bf16.msra.mxu1 %v1351_v25 }
 0x370   : > { %1266 = vmatprep.subr.bf16.mxu1 %v1419_v1 }
 0x373   : > { %1267 = vmatpush3.bf16.msra.mxu1 %v1352_v26 }
 0x374   : > { %1268 = vmatprep.subr.bf16.mxu1 %v1419_v1 }
 0x377   : > { %1269 = vmatpush3.bf16.msra.mxu1 %v1353_v27 }
 0x378   : > { %1270 = vmatprep.subr.bf16.mxu1 %v1419_v1 }
 0x37b   : > { %1271 = vmatpush3.bf16.msra.mxu1 %v1354_v28 }
 0x41e   : > { %v498_v41 = vpop.f32.mrf.mxu1 }
 0x41f   : > { %v499_v42 = vadd.f32 %v498_v41, %v415_v38  ;;  %v1669_v41 = vld [vmem:[%s1737_s2 + $0x8] sm:$0xff] }
 0x420   : > { %v1234_v43 = vpop.f32.mrf.mxu1 }
 0x421   : > { %v1072_v44 = vmul.f32 -1.442695, %v499_v42  ;;  %v665_v43 = vrot.slane %v1669_v41, %v225_v12  ;;  %v1357_v12 = vld [vmem:[%s1736_s1 + $0x128] sm:$0xff]  }
 0x422   : > { %v501_v45 = vpop.f32.mrf.mxu1 }
 0x423   : > { %1371 = vpow2.f32 %v1072_v44  ;;  %v502_v46 = vadd.f32 %v501_v45, %v415_v38  ;;  %v659_v38 = vrot.slane %v1513_v13, %v658_v35  ;;  %v1355_v13 = vld [vmem:[%s1736_s1 + $0x138] sm:$0xff]  }
 0x424   : > { %v1235_v48 = vpop.f32.mrf.mxu1 }
 0x425   : > { %v1073_v49 = vmul.f32 -1.442695, %v502_v46 }
 0x427   : > { %1373 = vpow2.f32 %v1073_v49 }
 0x430   : > { %v1372_v51 = vpop.eup %1371 }
 0x431   : > { %v511_v52 = vadd.f32 1.0, %v1372_v51 }
 0x433   : > { %1375 = vrcp.f32 %v511_v52  ;;  %v1356_v52 = vld [vmem:[%s1736_s1 + $0x130] sm:$0xff]  }
 0x434   : > { %v1374_v53 = vpop.eup %1373 }
 0x435   : > { %v512_v54 = vadd.f32 1.0, %v1374_v53  ;;  %v1358_v53 = vld [vmem:[%s1736_s1 + $0x120] sm:$0xff]  }
 0x437   : > { %1377 = vrcp.f32 %v512_v54  ;;  %v1359_v54 = vld [vmem:[%s1736_s1 + $0x118] sm:$0xff]  }
 0x440   : > { %v1376_v55 = vpop.eup %1375 }
 0x441   : > { %v517_v57 = vmul.f32 %v1376_v55, %v499_v42  ;;  %v1360_v55 = vld [vmem:[%s1736_s1 + $0x110] sm:$0xff]  }
 0x444   : > { %v1378_v56 = vpop.eup %1377 }
 0x445   : > { %v518_v58 = vmul.f32 %v1378_v56, %v502_v46  ;;  %v1361_v56 = vld [vmem:[%s1736_s1 + $0x108] sm:$0xff]  }
 0x447   : > { %v519_v59 = vpack.c.bf16 %v518_v58, %v517_v57  ;;  %v1362_v57 = vld [vmem:[%s1736_s1 + $0x100] sm:$0xff]   ;;  %v689_v58 = vrot.slane %v1669_v41, %v348_v39 }
 0x449   : > { %1253 = vmatmul.mubr.bf16.vlgmr.msra.gmra.mxu0 %v519_v59 }
 0x44a   : > { %1292 = vmatprep.mubr.msk.bf16.mxu0 %vm1420_vm0, %v1419_v1  ;;  %1277 = vmatpush3.bf16.msra.mxu0 %v1355_v13 }
 0x44b   : > { %1278 = vmatprep.subr.bf16.mxu0 %v1419_v1 }
 0x44e   : > { %1279 = vmatpush3.bf16.msra.mxu0 %v1356_v52 }
 0x44f   : > { %1280 = vmatprep.subr.bf16.mxu0 %v1419_v1 }
 0x452   : > { %1281 = vmatpush3.bf16.msra.mxu0 %v1357_v12 }
 0x453   : > { %1282 = vmatprep.subr.bf16.mxu0 %v1419_v1 }
 0x456   : > { %1283 = vmatpush3.bf16.msra.mxu0 %v1358_v53 }
 0x457   : > { %1284 = vmatprep.subr.bf16.mxu0 %v1419_v1 }
 0x45a   : > { %1285 = vmatpush3.bf16.msra.mxu0 %v1359_v54 }
 0x45b   : > { %1286 = vmatprep.subr.bf16.mxu0 %v1419_v1 }
 0x45e   : > { %1287 = vmatpush3.bf16.msra.mxu0 %v1360_v55 }
 0x45f   : > { %1288 = vmatprep.subr.bf16.mxu0 %v1419_v1 }
 0x462   : > { %1289 = vmatpush3.bf16.msra.mxu0 %v1361_v56 }
 0x463   : > { %1290 = vmatprep.subr.bf16.mxu0 %v1419_v1 }
 0x466   : > { %1291 = vmatpush3.bf16.msra.mxu0 %v1362_v57 }
 0x509   : > { %v623_v62 = vpop.f32.mrf.mxu0 }
 0x50a   : > { %v624_v63 = vadd.f32 %v623_v62, %v540_v61 }
 0x50b   : > { %v1254_v0 = vpop.f32.mrf.mxu0 }
 0x50c   : > { %v1622_v2 = vadd.f32 %v624_v63, %v1531_v47 }
 0x50d   : > { %v626_v3 = vpop.f32.mrf.mxu0 }
 0x50e   : > { %v627_v4 = vadd.f32 %v626_v3, %v540_v61  ;;  %632 = vadd.xlane.f32.xlu0 %v1622_v2 }
 0x50f   : > { %v1255_v5 = vpop.f32.mrf.mxu0 }
 0x510   : > { %v1626_v6 = vadd.f32 %v627_v4, %v1534_v50 }
 0x512   : > { %634 = vadd.xlane.f32.xlu1 %v1626_v6 }
 0x597   : > { %v633_v8 = vpop.xlane.xlu0 %632 }
 0x598   : > { %v636_v47 = vmul.f32 0.03125, %v633_v8 }
 0x59a   : > { %v638_v9 = vsub.f32 %v1622_v2, %v636_v47 }
 0x59b   : > { %v635_v10 = vpop.xlane.xlu1 %634 }
 0x59c   : > { %v637_v14 = vmul.f32 0.03125, %v635_v10  ;;  %v640_v16 = vmul.f32 %v1519_v24, %v638_v9 }
 0x59e   : > { %v639_v50 = vsub.f32 %v1626_v6, %v637_v14  ;;  %v642_v17 = vmul.f32 %v640_v16, %v640_v16 }
 0x5a0   : > { %644 = vadd.xlane.f32.xlu0 %v642_v17  ;;  %v641_v18 = vmul.f32 %v1519_v24, %v639_v50 }
 0x5a2   : > { %v643_v20 = vmul.f32 %v641_v18, %v641_v18 }
 0x5a4   : > { %646 = vadd.xlane.f32.xlu1 %v643_v20 }
 0x629   : > { %v645_v29 = vpop.xlane.xlu0 %644 }
 0x62a   : > { %v648_v30 = vmul.f32 0.03125, %v645_v29 }
 0x62c   : > { %v650_v31 = vadd.f32 1e-05, %v648_v30 }
 0x62d   : > { %v647_v32 = vpop.xlane.xlu1 %646 }
 0x62e   : > { %1379 = vrsqrt.f32 %v650_v31  ;;  %v649_v33 = vmul.f32 0.03125, %v647_v32 }
 0x630   : > { %v651_v34 = vadd.f32 1e-05, %v649_v33 }
 0x632   : > { %1381 = vrsqrt.f32 %v651_v34 }
 0x63b   : > { %v1380_v36 = vpop.eup %1379 }
 0x63c   : > { %v654_v37 = vmul.f32 %v1380_v36, %v640_v16  ;;  %v814_v16 = vrot.slane %v1669_v41, %v354_v40 }
 0x63e   : > { %v660_v45 = vmul.f32 %v659_v38, %v654_v37 }
 0x63f   : > { %v1382_v42 = vpop.eup %1381 }
 0x640   : > { %v655_v44 = vmul.f32 %v1382_v42, %v641_v18  ;;  %v666_v48 = vadd.f32 %v665_v43, %v660_v45  ;;  %v933_v42 = vrot.slane %v1669_v41, %v384_v15 }
 0x642   : > { %v661_v46 = vmul.f32 %v659_v38, %v655_v44 }
 0x644   : > { %v667_v49 = vadd.f32 %v665_v43, %v661_v46 }
 0x646   : > { %v668_v51 = vpack.c.bf16 %v667_v49, %v666_v48 }
 0x648   : > { %1273 = vmatmul.mubr.bf16.vlgmr.msra.gmra.mxu1 %v668_v51 }
 0x708   : > { %v772_v59 = vpop.f32.mrf.mxu1 }
 0x709   : > { %v773_v60 = vadd.f32 %v772_v59, %v689_v58 }
 0x70a   : > { %v1274_v61 = vpop.f32.mrf.mxu1 }
 0x70b   : > { %v1122_v62 = vmul.f32 -1.442695, %v773_v60 }
 0x70c   : > { %v775_v63 = vpop.f32.mrf.mxu1 }
 0x70d   : > { %1383 = vpow2.f32 %v1122_v62  ;;  %v776_v0 = vadd.f32 %v775_v63, %v689_v58 }
 0x70e   : > { %v1275_v3 = vpop.f32.mrf.mxu1 }
 0x70f   : > { %v1123_v4 = vmul.f32 -1.442695, %v776_v0 }
 0x711   : > { %1385 = vpow2.f32 %v1123_v4 }
 0x71a   : > { %v1384_v1 = vpop.eup %1383 }
 0x71b   : > { %v785_v5 = vadd.f32 1.0, %v1384_v1 }
 0x71d   : > { %1387 = vrcp.f32 %v785_v5 }
 0x71e   : > { %v1386_v7 = vpop.eup %1385 }
 0x71f   : > { %v786_v8 = vadd.f32 1.0, %v1386_v7 }
 0x721   : > { %1389 = vrcp.f32 %v786_v8 }
 0x72a   : > { %v1388_v47 = vpop.eup %1387 }
 0x72b   : > { %v791_v10 = vmul.f32 %v1388_v47, %v773_v60 }
 0x72e   : > { %v1390_v9 = vpop.eup %1389 }
 0x72f   : > { %v792_v39 = vmul.f32 %v1390_v9, %v776_v0 }
 0x731   : > { %v793_v14 = vpack.c.bf16 %v792_v39, %v791_v10 }
 0x733   : > { %1293 = vmatmul.mubr.bf16.vlgmr.msra.gmra.mxu0 %v793_v14 }
 0x7f3   : > { %v897_v50 = vpop.f32.mrf.mxu0 }
 0x7f4   : > { %v898_v17 = vadd.f32 %v897_v50, %v814_v16 }
 0x7f5   : > { %v1294_v18 = vpop.f32.mrf.mxu0 }
 0x7f6   : > { %v904_v20 = vadd.f32 %v898_v17, %v1622_v2 }
 0x7f7   : > { %v900_v21 = vpop.f32.mrf.mxu0 }
 0x7f8   : > { %v901_v22 = vadd.f32 %v900_v21, %v814_v16  ;;  %906 = vadd.xlane.f32.xlu0 %v904_v20 }
 0x7f9   : > { %v1295_v23 = vpop.f32.mrf.mxu0 }
 0x7fa   : > { %v905_v25 = vadd.f32 %v901_v22, %v1626_v6 }
 0x7fc   : > { %908 = vadd.xlane.f32.xlu1 %v905_v25 }
 0x881   : > { %v907_v26 = vpop.xlane.xlu0 %906 }
 0x882   : > { %v910_v27 = vmul.f32 0.03125, %v907_v26 }
 0x884   : > { %v912_v28 = vsub.f32 %v904_v20, %v910_v27 }
 0x885   : > { %v909_v29 = vpop.xlane.xlu1 %908 }
 0x886   : > { %v911_v30 = vmul.f32 0.03125, %v909_v29  ;;  %v914_v31 = vmul.f32 %v1519_v24, %v912_v28 }
 0x888   : > { %v913_v40 = vsub.f32 %v905_v25, %v911_v30  ;;  %v916_v32 = vmul.f32 %v914_v31, %v914_v31 }
 0x88a   : > { %918 = vadd.xlane.f32.xlu0 %v916_v32  ;;  %v915_v33 = vmul.f32 %v1519_v24, %v913_v40  ;;  %v939_v24 = vrot.slane %v1669_v41, %v390_v19 }
 0x88c   : > { %v917_v2 = vmul.f32 %v915_v33, %v915_v33 }
 0x88e   : > { %920 = vadd.xlane.f32.xlu1 %v917_v2 }
 0x913   : > { %v919_v34 = vpop.xlane.xlu0 %918 }
 0x914   : > { %v922_v35 = vmul.f32 0.03125, %v919_v34 }
 0x916   : > { %v924_v36 = vadd.f32 1e-05, %v922_v35 }
 0x917   : > { %v921_v37 = vpop.xlane.xlu1 %920 }
 0x918   : > { %1391 = vrsqrt.f32 %v924_v36  ;;  %v923_v6 = vmul.f32 0.03125, %v921_v37 }
 0x91a   : > { %v925_v38 = vadd.f32 1e-05, %v923_v6 }
 0x91c   : > { %1393 = vrsqrt.f32 %v925_v38 }
 0x925   : > { %v1392_v43 = vpop.eup %1391 }
 0x926   : > { %v928_v44 = vmul.f32 %v1392_v43, %v914_v31 }
 0x928   : > { %v934_v45 = vmul.f32 %v933_v42, %v928_v44 }
 0x929   : > { %v1394_v46 = vpop.eup %1393 }
 0x92a   : > { %v940_v48 = vadd.f32 %v939_v24, %v934_v45  ;;  %v929_v49 = vmul.f32 %v1394_v46, %v915_v33 }
 0x92c   : > { %v935_v51 = vmul.f32 %v933_v42, %v929_v49 }
 0x92e   : > { %v941_v13 = vadd.f32 %v939_v24, %v935_v51 }
 0x930   : > { %v947_v52 = vadd.f32 %v941_v13, %v940_v48 }
 0x932   : > { %v948_v12 = vrot.slane %v947_v52, 4 }
 0x934   : > { %v949_v53 = vadd.f32 %v948_v12, %v947_v52 }
 0x936   : > { %v950_v54 = vrot.slane %v949_v53, 2 }
 0x938   : > { %v951_v55 = vadd.f32 %v950_v54, %v949_v53 }
 0x93a   : > { %v952_v56 = vrot.slane %v951_v55, 1 }
 0x93c   : > { %v953_v15 = vadd.f32 %v952_v56, %v951_v55 }
 0x93e   : > { %v961_v11 = vmul.f32 0.0625, %v953_v15 }
 0x940   : > { %962 = vst [vmem:[%s196_s17] sm:$0xff] %v961_v11 }
 0x941 PF: > { %s13_s14 = sadd.s32 1, %s1417_s14   ;;  %s1739_s12 = smov %s1413_s13 }
 0x942   : > { %p10_p5 = scmp.ge.s32.totalorder %s13_s14, 4   ;;  %s1740_s13 = smov %s1742_s15 }
 0x944   :  { %12 = sbr.rel (!%p10_p5) target bundleno = 2 (0x2), region = 74 }

</bundles_post_ra>
